<compile_context>
chip_gen: v5e
topology: v5e:2x2
jax: 0.10.0
libtpu: 0.0.40
codegen_flags: <defaults>
</compile_context>

<pallas_src>
import jax
import jax.numpy as jnp
from jax.experimental import pallas as pl
from jax.experimental.pallas import tpu as pltpu

NUM_HIDDEN_LAYERS = 2


def _round_up(n, m):
    return ((n + m - 1) // m) * m


def _pad2(a, rows, cols):
    """Zero-pad a 2-D array up to (rows, cols)."""
    return jnp.pad(a, ((0, rows - a.shape[0]), (0, cols - a.shape[1])))


def _sigmoid_f32(h):
    # exp and approx-reciprocal both issue on the EUP slot (otherwise idle in
    # this kernel), keeping the divide off the VALU. Elementwise math stays f32.
    return pl.reciprocal(1.0 + jnp.exp(-h), approx=True)


def _mlp_kernel(x_ref,
                w_in_ref, b_in_ref,
                w_h0_ref, b_h0_ref,
                w_h1_ref, b_h1_ref,
                w_out_ref, b_out_ref,
                o_ref):
    """One batch tile of the full MLP forward. Weights stay resident in VMEM."""
    cd = w_in_ref.dtype  # compute dtype (bf16 by default)

    def linear(h, w_ref, b_ref):
        # Cast the activation to the MXU operand dtype right at the dot (for the
        # first layer this fuses the x f32->bf16 cast into the kernel), f32
        # accumulate, f32 bias-add.
        acc = jnp.dot(h.astype(cd), w_ref[...], preferred_element_type=jnp.float32)
        return acc + b_ref[...]

    x = x_ref[...]                                            # (TB, D_pad) f32

    h = _sigmoid_f32(linear(x, w_in_ref, b_in_ref))           # input layer
    h = _sigmoid_f32(linear(h, w_h0_ref, b_h0_ref))           # hidden layer 0
    h = _sigmoid_f32(linear(h, w_h1_ref, b_h1_ref))           # hidden layer 1
    y = linear(h, w_out_ref, b_out_ref)                       # output layer

    o_ref[...] = y.astype(o_ref.dtype)                        # (TB, O_pad), lane-dense


def prepare_params(params, *, use_bf16=True):
    """One-time weight prep: lane-dense zero-padding + compute-dtype cast.

    Zero-padding rows AND columns keeps real outputs bit-identical: padded
    hidden lanes become sigmoid(0)=0.5, but the matching (zero) weight rows of
    the next layer annul them, and padded bias lanes are zero.
    NOTE: this invariant is what makes the padding scheme correct; do not relax
    the row-padding or use nonzero padding values.
    """
    w_in, b_in = params["w_in"], params["b_in"]
    w_h0, b_h0 = params["w_h0"], params["b_h0"]
    w_h1, b_h1 = params["w_h1"], params["b_h1"]
    w_out, b_out = params["w_out"], params["b_out"]

    input_dim, hidden_dim = w_in.shape
    output_dim = w_out.shape[1]

    D_pad = _round_up(input_dim, 128)
    H_pad = _round_up(hidden_dim, 128)
    O_pad = _round_up(output_dim, 128)

    cd = jnp.bfloat16 if use_bf16 else jnp.float32

    prepped = {
        # MXU operands in compute dtype.
        "w_in": _pad2(w_in, D_pad, H_pad).astype(cd),
        "w_h0": _pad2(w_h0, H_pad, H_pad).astype(cd),
        "w_h1": _pad2(w_h1, H_pad, H_pad).astype(cd),
        "w_out": _pad2(w_out, H_pad, O_pad).astype(cd),
        # Biases stay f32 (elementwise path is f32 on all generations).
        "b_in": _pad2(b_in.reshape(1, -1), 1, H_pad).astype(jnp.float32),
        "b_h0": _pad2(b_h0.reshape(1, -1), 1, H_pad).astype(jnp.float32),
        "b_h1": _pad2(b_h1.reshape(1, -1), 1, H_pad).astype(jnp.float32),
        "b_out": _pad2(b_out.reshape(1, -1), 1, O_pad).astype(jnp.float32),
    }
    meta = {
        "input_dim": input_dim, "hidden_dim": hidden_dim, "output_dim": output_dim,
        "D_pad": D_pad, "H_pad": H_pad, "O_pad": O_pad,
        "compute_dtype": cd,
    }
    return prepped, meta


def _choose_tb(b_padded8):
    """Batch-tile size.

    Small batches: one sublane-aligned tile (the B=2 harness case is pure
    launch-overhead; tile tuning cannot help there).
    Large batches: 512..1024 tiles (mem-bound sweet spot), 128-aligned, with at
    least 2 grid steps so v7x's second TensorCore gets a share of the batch axis.
    """
    if b_padded8 <= 512:
        return b_padded8
    if b_padded8 <= 2048:
        return min(512, _round_up(pl.cdiv(b_padded8, 2), 128))
    return 1024


def mlp_forward(x_nchw, prepped, meta, *, unpad_features=True):
    """x_nchw: (B, C, H, W) float32. prepped/meta: from prepare_params()."""
    B = x_nchw.shape[0]
    x_flat = x_nchw.reshape(B, -1)                          # nn.Flatten (row-major)
    input_dim = meta["input_dim"]
    assert x_flat.shape[1] == input_dim

    D_pad, H_pad, O_pad = meta["D_pad"], meta["H_pad"], meta["O_pad"]
    output_dim = meta["output_dim"]
    cd_bytes = jnp.dtype(meta["compute_dtype"]).itemsize

    # --- batch tiling ---------------------------------------------------------
    B8 = _round_up(B, 8)
    TB = _choose_tb(B8)
    B_pad = _round_up(B8, TB)
    grid = (B_pad // TB,)

    # x stays f32; pad only the batch remainder (and features only if needed —
    # a no-op for the default 1024-wide input). The bf16 cast happens in-kernel.
    pad_b = B_pad - B
    pad_d = D_pad - input_dim
    if pad_b or pad_d:
        x_flat = jnp.pad(x_flat, ((0, pad_b), (0, pad_d)))
    x_flat = x_flat.astype(jnp.float32)

    # --- cost estimate (advisory) --------------------------------------------
    flops = 2 * B_pad * (D_pad * H_pad + 2 * H_pad * H_pad + H_pad * O_pad)
    transcendentals = 6 * B_pad * H_pad                      # 3 sigmoids: exp + approx recip
    bytes_accessed = (
        B_pad * D_pad * 4                                    # x (f32)
        + (D_pad * H_pad + 2 * H_pad * H_pad + H_pad * O_pad) * cd_bytes  # weights, read once
        + (3 * H_pad + O_pad) * 4                            # biases (f32)
        + B_pad * O_pad * 4                                  # output (f32)
    )
    cost = pl.CostEstimate(flops=flops,
                           transcendentals=transcendentals,
                           bytes_accessed=bytes_accessed)

    # Weights/biases: constant index_map -> DMA'd once, resident across tiles.
    const = lambda i: (0, 0)

    out = pl.pallas_call(
        _mlp_kernel,
        out_shape=jax.ShapeDtypeStruct((B_pad, O_pad), jnp.float32),
        grid=grid,
        in_specs=[
            pl.BlockSpec((TB, D_pad), lambda i: (i, 0)),     # x batch tile (f32)
            pl.BlockSpec((D_pad, H_pad), const),             # w_in
            pl.BlockSpec((1, H_pad), const),                 # b_in
            pl.BlockSpec((H_pad, H_pad), const),             # w_h0
            pl.BlockSpec((1, H_pad), const),                 # b_h0
            pl.BlockSpec((H_pad, H_pad), const),             # w_h1
            pl.BlockSpec((1, H_pad), const),                 # b_h1
            pl.BlockSpec((H_pad, O_pad), const),             # w_out
            pl.BlockSpec((1, O_pad), const),                 # b_out
        ],
        out_specs=pl.BlockSpec((TB, O_pad), lambda i: (i, 0)),
        compiler_params=pltpu.CompilerParams(
            dimension_semantics=("parallel",)),              # batch axis shards across v7x TCs
        cost_estimate=cost,
    )(x_flat,
      prepped["w_in"], prepped["b_in"],
      prepped["w_h0"], prepped["b_h0"],
      prepped["w_h1"], prepped["b_h1"],
      prepped["w_out"], prepped["b_out"])

    if unpad_features:
        return out[:B, :output_dim]
    return out[:B]                                           # padded (B, O_pad) slab


def init_params(key, input_dim, hidden_dim, output_dim):
    """Deterministic init mirroring nn.Linear shapes.

    Weights are stored transposed relative to PyTorch: (in_features, out_features),
    so that the kernel's x @ W matches PyTorch's x @ weight.T.
    """
    def linear(k, fan_in, fan_out):
        kw, kb = jax.random.split(k)
        bound = 1.0 / jnp.sqrt(fan_in)
        w = jax.random.uniform(kw, (fan_in, fan_out), jnp.float32, -bound, bound)
        b = jax.random.uniform(kb, (fan_out,), jnp.float32, -bound, bound)
        return w, b

    k_in, k_h0, k_h1, k_out = jax.random.split(key, 4)
    w_in, b_in = linear(k_in, input_dim, hidden_dim)
    w_h0, b_h0 = linear(k_h0, hidden_dim, hidden_dim)
    w_h1, b_h1 = linear(k_h1, hidden_dim, hidden_dim)
    w_out, b_out = linear(k_out, hidden_dim, output_dim)
    return {
        "w_in": w_in, "b_in": b_in,
        "w_h0": w_h0, "b_h0": b_h0,
        "w_h1": w_h1, "b_h1": b_h1,
        "w_out": w_out, "b_out": b_out,
    }


if __name__ == "__main__":
    key = jax.random.PRNGKey(0)
    k_x, k_p = jax.random.split(key)

    # Small, module-consistent shapes: image-like NCHW input that gets flattened.
    B, C, H, W = 2, 4, 16, 16
    input_dim = C * H * W          # 1024 (already lane-dense)
    hidden_dim = 32
    output_dim = 10

    x = jax.random.normal(k_x, (B, C, H, W), dtype=jnp.float32)
    params = init_params(k_p, input_dim, hidden_dim, output_dim)

    # One-time weight prep (padding + bf16 cast hoisted out of the forward).
    prepped, meta = prepare_params(params, use_bf16=True)
    jax.block_until_ready(prepped)

    y = mlp_forward(x, prepped, meta)
    jax.block_until_ready(y)
    assert y.shape == (B, output_dim)

    # Reference 1: pure f32 (PyTorch-equivalent semantics); loose tolerance
    # accounts for bf16 MXU operands + approx reciprocal in the kernel.
    xf = x.reshape(B, -1)
    h = jax.nn.sigmoid(xf @ params["w_in"] + params["b_in"])
    h = jax.nn.sigmoid(h @ params["w_h0"] + params["b_h0"])
    h = jax.nn.sigmoid(h @ params["w_h1"] + params["b_h1"])
    y_ref_f32 = h @ params["w_out"] + params["b_out"]
    assert jnp.allclose(y, y_ref_f32, atol=3e-2, rtol=3e-2)

    # Reference 2: matched bf16-operand / f32-accumulate path (same quantization
    # as the kernel); only the approx-reciprocal differs -> tight tolerance.
    def matched_ref(x_in, p):
        cd = jnp.bfloat16
        hh = x_in.reshape(x_in.shape[0], -1)
        def lin(a, w, b):
            return jnp.dot(a.astype(cd), w.astype(cd),
                           preferred_element_type=jnp.float32) + b
        hh = jax.nn.sigmoid(lin(hh, p["w_in"], p["b_in"]))
        hh = jax.nn.sigmoid(lin(hh, p["w_h0"], p["b_h0"]))
        hh = jax.nn.sigmoid(lin(hh, p["w_h1"], p["b_h1"]))
        return lin(hh, p["w_out"], p["b_out"])

    y_ref_bf16 = matched_ref(x, params)
    assert jnp.allclose(y, y_ref_bf16, atol=1e-2, rtol=1e-2)

    print("KERNEL_OK")
</pallas_src>

<mosaic_0001>
module attributes {stable_mosaic.version = 11 : i64} {
  func.func @_mlp_kernel(%arg0: i32, %arg1: memref<8x1024xf32, #tpu.memory_space<vmem>>, %arg2: memref<1024x128xbf16, #tpu.memory_space<vmem>>, %arg3: memref<1x128xf32, #tpu.memory_space<vmem>>, %arg4: memref<128x128xbf16, #tpu.memory_space<vmem>>, %arg5: memref<1x128xf32, #tpu.memory_space<vmem>>, %arg6: memref<128x128xbf16, #tpu.memory_space<vmem>>, %arg7: memref<1x128xf32, #tpu.memory_space<vmem>>, %arg8: memref<128x128xbf16, #tpu.memory_space<vmem>>, %arg9: memref<1x128xf32, #tpu.memory_space<vmem>>, %arg10: memref<8x128xf32, #tpu.memory_space<vmem>>) attributes {dimension_semantics = [#tpu.dimension_semantics<parallel>], iteration_bounds = array<i64: 1>, scalar_prefetch = 0 : i64, scratch_operands = 0 : i64, tpu.core_type = #tpu.core_type<tc>, window_params = [{transform_indices = @transform_0, window_bounds = array<i64: 8, 1024>}, {pipeline_mode = #tpu.pipeline_mode<synchronous>, transform_indices = @transform_1, window_bounds = array<i64: 1024, 128>}, {pipeline_mode = #tpu.pipeline_mode<synchronous>, transform_indices = @transform_2, window_bounds = array<i64: 1, 128>}, {pipeline_mode = #tpu.pipeline_mode<synchronous>, transform_indices = @transform_3, window_bounds = array<i64: 128, 128>}, {pipeline_mode = #tpu.pipeline_mode<synchronous>, transform_indices = @transform_4, window_bounds = array<i64: 1, 128>}, {pipeline_mode = #tpu.pipeline_mode<synchronous>, transform_indices = @transform_5, window_bounds = array<i64: 128, 128>}, {pipeline_mode = #tpu.pipeline_mode<synchronous>, transform_indices = @transform_6, window_bounds = array<i64: 1, 128>}, {pipeline_mode = #tpu.pipeline_mode<synchronous>, transform_indices = @transform_7, window_bounds = array<i64: 128, 128>}, {pipeline_mode = #tpu.pipeline_mode<synchronous>, transform_indices = @transform_8, window_bounds = array<i64: 1, 128>}, {transform_indices = @transform_9, window_bounds = array<i64: 8, 128>}]} {
    %c0 = arith.constant 0 : index
    %c0_0 = arith.constant 0 : index
    %0 = vector.load %arg1[%c0, %c0_0] : memref<8x1024xf32, #tpu.memory_space<vmem>>, vector<8x1024xf32>
    %1 = arith.truncf %0 : vector<8x1024xf32> to vector<8x1024xbf16>
    %c0_1 = arith.constant 0 : index
    %c0_2 = arith.constant 0 : index
    %2 = vector.load %arg2[%c0_1, %c0_2] : memref<1024x128xbf16, #tpu.memory_space<vmem>>, vector<1024x128xbf16>
    %cst = arith.constant dense<0.000000e+00> : vector<8x128xf32>
    %3 = tpu.matmul %1, %2, %cst {dimension_numbers = #tpu.dot_dimension_numbers<[1], [0], [0], [1], [0, 0, 1, 1], [], []>} : vector<8x1024xbf16>, vector<1024x128xbf16>, vector<8x128xf32> -> vector<8x128xf32>
    %c0_3 = arith.constant 0 : index
    %c0_4 = arith.constant 0 : index
    %4 = vector.load %arg3[%c0_3, %c0_4] : memref<1x128xf32, #tpu.memory_space<vmem>>, vector<1x128xf32>
    %5 = vector.broadcast %4 : vector<1x128xf32> to vector<8x128xf32>
    %6 = arith.addf %3, %5 : vector<8x128xf32>
    %cst_5 = arith.constant 0.000000e+00 : f32
    %7 = vector.broadcast %cst_5 : f32 to vector<8x128xf32>
    %8 = arith.subf %7, %6 : vector<8x128xf32>
    %9 = math.exp %8 : vector<8x128xf32>
    %cst_6 = arith.constant 1.000000e+00 : f32
    %10 = vector.broadcast %cst_6 : f32 to vector<8x128xf32>
    %11 = arith.addf %10, %9 : vector<8x128xf32>
    %12 = tpu.reciprocal %11 {approx = true} : vector<8x128xf32> -> vector<8x128xf32>
    %13 = arith.truncf %12 : vector<8x128xf32> to vector<8x128xbf16>
    %c0_7 = arith.constant 0 : index
    %c0_8 = arith.constant 0 : index
    %14 = vector.load %arg4[%c0_7, %c0_8] : memref<128x128xbf16, #tpu.memory_space<vmem>>, vector<128x128xbf16>
    %cst_9 = arith.constant dense<0.000000e+00> : vector<8x128xf32>
    %15 = tpu.matmul %13, %14, %cst_9 {dimension_numbers = #tpu.dot_dimension_numbers<[1], [0], [0], [1], [0, 0, 1, 1], [], []>} : vector<8x128xbf16>, vector<128x128xbf16>, vector<8x128xf32> -> vector<8x128xf32>
    %c0_10 = arith.constant 0 : index
    %c0_11 = arith.constant 0 : index
    %16 = vector.load %arg5[%c0_10, %c0_11] : memref<1x128xf32, #tpu.memory_space<vmem>>, vector<1x128xf32>
    %17 = vector.broadcast %16 : vector<1x128xf32> to vector<8x128xf32>
    %18 = arith.addf %15, %17 : vector<8x128xf32>
    %cst_12 = arith.constant 0.000000e+00 : f32
    %19 = vector.broadcast %cst_12 : f32 to vector<8x128xf32>
    %20 = arith.subf %19, %18 : vector<8x128xf32>
    %21 = math.exp %20 : vector<8x128xf32>
    %cst_13 = arith.constant 1.000000e+00 : f32
    %22 = vector.broadcast %cst_13 : f32 to vector<8x128xf32>
    %23 = arith.addf %22, %21 : vector<8x128xf32>
    %24 = tpu.reciprocal %23 {approx = true} : vector<8x128xf32> -> vector<8x128xf32>
    %25 = arith.truncf %24 : vector<8x128xf32> to vector<8x128xbf16>
    %c0_14 = arith.constant 0 : index
    %c0_15 = arith.constant 0 : index
    %26 = vector.load %arg6[%c0_14, %c0_15] : memref<128x128xbf16, #tpu.memory_space<vmem>>, vector<128x128xbf16>
    %cst_16 = arith.constant dense<0.000000e+00> : vector<8x128xf32>
    %27 = tpu.matmul %25, %26, %cst_16 {dimension_numbers = #tpu.dot_dimension_numbers<[1], [0], [0], [1], [0, 0, 1, 1], [], []>} : vector<8x128xbf16>, vector<128x128xbf16>, vector<8x128xf32> -> vector<8x128xf32>
    %c0_17 = arith.constant 0 : index
    %c0_18 = arith.constant 0 : index
    %28 = vector.load %arg7[%c0_17, %c0_18] : memref<1x128xf32, #tpu.memory_space<vmem>>, vector<1x128xf32>
    %29 = vector.broadcast %28 : vector<1x128xf32> to vector<8x128xf32>
    %30 = arith.addf %27, %29 : vector<8x128xf32>
    %cst_19 = arith.constant 0.000000e+00 : f32
    %31 = vector.broadcast %cst_19 : f32 to vector<8x128xf32>
    %32 = arith.subf %31, %30 : vector<8x128xf32>
    %33 = math.exp %32 : vector<8x128xf32>
    %cst_20 = arith.constant 1.000000e+00 : f32
    %34 = vector.broadcast %cst_20 : f32 to vector<8x128xf32>
    %35 = arith.addf %34, %33 : vector<8x128xf32>
    %36 = tpu.reciprocal %35 {approx = true} : vector<8x128xf32> -> vector<8x128xf32>
    %37 = arith.truncf %36 : vector<8x128xf32> to vector<8x128xbf16>
    %c0_21 = arith.constant 0 : index
    %c0_22 = arith.constant 0 : index
    %38 = vector.load %arg8[%c0_21, %c0_22] : memref<128x128xbf16, #tpu.memory_space<vmem>>, vector<128x128xbf16>
    %cst_23 = arith.constant dense<0.000000e+00> : vector<8x128xf32>
    %39 = tpu.matmul %37, %38, %cst_23 {dimension_numbers = #tpu.dot_dimension_numbers<[1], [0], [0], [1], [0, 0, 1, 1], [], []>} : vector<8x128xbf16>, vector<128x128xbf16>, vector<8x128xf32> -> vector<8x128xf32>
    %c0_24 = arith.constant 0 : index
    %c0_25 = arith.constant 0 : index
    %40 = vector.load %arg9[%c0_24, %c0_25] : memref<1x128xf32, #tpu.memory_space<vmem>>, vector<1x128xf32>
    %41 = vector.broadcast %40 : vector<1x128xf32> to vector<8x128xf32>
    %42 = arith.addf %39, %41 : vector<8x128xf32>
    %c0_26 = arith.constant 0 : index
    %c0_27 = arith.constant 0 : index
    %43 = vector.load %arg10[%c0_26, %c0_27] : memref<8x128xf32, #tpu.memory_space<vmem>>, vector<8x128xf32>
    tpu.vector_store %arg10[%c0_26, %c0_27], %42 {strides = array<i32>} : memref<8x128xf32, #tpu.memory_space<vmem>>, vector<8x128xf32>,
    return
  }
  func.func @transform_0(%arg0: i32) -> (i32, i32) {
    %c0_i32 = arith.constant 0 : i32
    %c0_i32_0 = arith.constant 0 : i32
    return %arg0, %c0_i32 : i32, i32
  }
  func.func @transform_1(%arg0: i32) -> (i32, i32) {
    %c0_i32 = arith.constant 0 : i32
    %c0_i32_0 = arith.constant 0 : i32
    %c0_i32_1 = arith.constant 0 : i32
    return %c0_i32, %c0_i32_0 : i32, i32
  }
  func.func @transform_2(%arg0: i32) -> (i32, i32) {
    %c0_i32 = arith.constant 0 : i32
    %c0_i32_0 = arith.constant 0 : i32
    %c0_i32_1 = arith.constant 0 : i32
    return %c0_i32, %c0_i32_0 : i32, i32
  }
  func.func @transform_3(%arg0: i32) -> (i32, i32) {
    %c0_i32 = arith.constant 0 : i32
    %c0_i32_0 = arith.constant 0 : i32
    %c0_i32_1 = arith.constant 0 : i32
    return %c0_i32, %c0_i32_0 : i32, i32
  }
  func.func @transform_4(%arg0: i32) -> (i32, i32) {
    %c0_i32 = arith.constant 0 : i32
    %c0_i32_0 = arith.constant 0 : i32
    %c0_i32_1 = arith.constant 0 : i32
    return %c0_i32, %c0_i32_0 : i32, i32
  }
  func.func @transform_5(%arg0: i32) -> (i32, i32) {
    %c0_i32 = arith.constant 0 : i32
    %c0_i32_0 = arith.constant 0 : i32
    %c0_i32_1 = arith.constant 0 : i32
    return %c0_i32, %c0_i32_0 : i32, i32
  }
  func.func @transform_6(%arg0: i32) -> (i32, i32) {
    %c0_i32 = arith.constant 0 : i32
    %c0_i32_0 = arith.constant 0 : i32
    %c0_i32_1 = arith.constant 0 : i32
    return %c0_i32, %c0_i32_0 : i32, i32
  }
  func.func @transform_7(%arg0: i32) -> (i32, i32) {
    %c0_i32 = arith.constant 0 : i32
    %c0_i32_0 = arith.constant 0 : i32
    %c0_i32_1 = arith.constant 0 : i32
    return %c0_i32, %c0_i32_0 : i32, i32
  }
  func.func @transform_8(%arg0: i32) -> (i32, i32) {
    %c0_i32 = arith.constant 0 : i32
    %c0_i32_0 = arith.constant 0 : i32
    %c0_i32_1 = arith.constant 0 : i32
    return %c0_i32, %c0_i32_0 : i32, i32
  }
  func.func @transform_9(%arg0: i32) -> (i32, i32) {
    %c0_i32 = arith.constant 0 : i32
    %c0_i32_0 = arith.constant 0 : i32
    return %arg0, %c0_i32 : i32, i32
  }
}

</mosaic_0001>

<bundles_post_ra>
// kernel: tpu_custom_call.1
= control target key start
LH: loop header
LB: loop body
LE: loop exit
PB: predicated region body
PF: predicated region fallthrough
CT: control target
= control target key end

     0   :  { %14 = vsyncpa [#allocation3], 0  ;;  %s1730_s0 = inlined_call_operand.hbm [shape: f32[8,1024], index: 0, kind: input, shape index: {}]   ;;  %s1731_s1 = inlined_call_operand.hbm [shape: bf16[1024,128], index: 1, kind: input, shape index: {}]   ;;  %s1732_s2 = inlined_call_operand.vmem [shape: f32[1,128], index: 2, kind: input, shape index: {}]   ;;  %s1733_s3 = inlined_call_operand.hbm [shape: bf16[128,128], index: 3, kind: input, shape index: {}]   ;;  %s1734_s4 = inlined_call_operand.vmem [shape: f32[1,128], index: 4, kind: input, shape index: {}]   ;;  %s1735_s5 = inlined_call_operand.hbm [shape: bf16[128,128], index: 5, kind: input, shape index: {}]   ;;  %s1736_s6 = inlined_call_operand.vmem [shape: f32[1,128], index: 6, kind: input, shape index: {}]   ;;  %s1737_s7 = inlined_call_operand.hbm [shape: bf16[128,128], index: 7, kind: input, shape index: {}]   ;;  %s1738_s8 = inlined_call_operand.vmem [shape: f32[1,128], index: 8, kind: input, shape index: {}]   ;;  %s1739_s9 = inlined_call_operand.hbm [shape: f32[8,128], index: 9, kind: output, shape index: {}]  }
   0x1   :  { %15 = vsyncpa [#allocation6], 0 }
   0x2   :  { %16 = vsyncpa [#allocation9], 0  ;;  %s33_s11 = sshll.u32 %s1731_s1, 4  ;;  %s34_s11 = int_to_ptr.hbm [resolvable:$true] %s33_s11 }
   0x3   :  { %17 = vsyncpa [#allocation4], 0  ;;  %s1642_s12 = smov [#allocation5]   ;;  %s63_s16 = sshll.u32 %s1735_s5, 4  ;;  %s64_s16 = int_to_ptr.hbm [resolvable:$true] %s63_s16 }
   0x4   :  { %s35_s13 = sshll.u32 %s1642_s12, 4  ;;  %s1643_s17 = smov 64   ;;  %s36_s13 = int_to_ptr.vmem [resolvable:$true] %s35_s13 }
   0x5   :  { %s1644_s18 = smov 4   ;;  %s1645_s19 = smov [#allocation8]  }
   0x6   :  { %41 = dma.hbm_to_vmem [thread:$0]  %s34_s11, 8192, %s36_s13, [#allocation6], %s1643_s17, %s1643_s17, %s1644_s18  }
   0x7   :  { %s65_s20 = sshll.u32 %s1645_s19, 4  ;;  %s23_s23 = sshll.u32 %s1730_s0, 4  ;;  %s66_s20 = int_to_ptr.vmem [resolvable:$true] %s65_s20  ;;  %s24_s23 = int_to_ptr.hbm [resolvable:$true] %s23_s23 }
   0x8   :  { %71 = dma.hbm_to_vmem [thread:$0]  %s64_s16, 1024, %s66_s20, [#allocation9], %s1643_s17, %s1643_s17, %s1644_s18  }
   0x9   :  { %s48_s25 = sshll.u32 %s1733_s3, 4  ;;  %s1646_s26 = smov [#allocation2]   ;;  %s49_s25 = int_to_ptr.hbm [resolvable:$true] %s48_s25 }
   0xa   :  { %s25_s27 = sshll.u32 %s1646_s26, 4  ;;  %s1647_s5 = smov [#allocation7]   ;;  %s26_s27 = int_to_ptr.vmem [resolvable:$true] %s25_s27 }
   0xb   :  { %28 = dma.hbm_to_vmem [thread:$0]  %s24_s23, 1024, %s26_s27, [#allocation3]  }
   0xc   :  { %s50_s28 = sshll.u32 %s1647_s5, 4  ;;  %s78_s10 = sshll.u32 %s1737_s7, 4  ;;  %s51_s28 = int_to_ptr.vmem [resolvable:$true] %s50_s28  ;;  %s79_s10 = int_to_ptr.hbm [resolvable:$true] %s78_s10 }
   0xd   :  { %56 = dma.hbm_to_vmem [thread:$0]  %s49_s25, 1024, %s51_s28, [#allocation6], %s1643_s17, %s1643_s17, %s1644_s18  }
   0xe   :  { %s1648_s0 = smov [#allocation10]  }
   0xf   :  { %s80_s11 = sshll.u32 %s1648_s0, 4  ;;  %s81_s11 = int_to_ptr.vmem [resolvable:$true] %s80_s11 }
  0x10   :  { %86 = dma.hbm_to_vmem [thread:$0]  %s79_s10, 1024, %s81_s11, [#allocation9], %s1643_s17, %s1643_s17, %s1644_s18  }
  0x11   :  { %1634 = dma.done.wait [#allocation3], 1024  }
  0x12   :  { %1635 = vsyncadd [#allocation3], 4294966272 }
  0x13   :  { %1636 = dma.done.wait [#allocation6], 9216  }
  0x14   :  { %1637 = vsyncadd [#allocation6], 4294958080 }
  0x15   :  { %1638 = dma.done.wait [#allocation9], 2048  }
  0x16   :  { %1639 = vsyncadd [#allocation9], 4294965248  ;;  %v1385_v0 = vld [vmem:[#allocation5 + $0x38] sm:$0xff]  ;;  %v1384_v4 = vld [vmem:[#allocation5 + $0x30] sm:$0xff]  ;;  %s1649_s16 = smov [#allocation11]   ;;  %s1014_s19 = sshll.u32 %s1739_s9, 4  ;;  %s1015_s19 = int_to_ptr.hbm [resolvable:$true] %s1014_s19 }
  0x17   :  { %v1393_v1 = vld [vmem:[#allocation5 + $0x78] sm:$0xff]  ;;  %641 = vmatpush.bf16.msra.mxu0 %v1385_v0  ;;  %v1392_v5 = vld [vmem:[#allocation5 + $0x70] sm:$0xff]  ;;  %v1383_v8 = vld [vmem:[#allocation5 + $0x28] sm:$0xff]  ;;  %s1012_s17 = sshll.u32 %s1649_s16, 4  ;;  %s1013_s17 = int_to_ptr.vmem [resolvable:$true] %s1012_s17 }
  0x18   :  { %v1401_v2 = vld [vmem:[#allocation5 + $0xb8] sm:$0xff]  ;;  %654 = vmatpush.bf16.msra.mxu1 %v1393_v1  ;;  %v1400_v6 = vld [vmem:[#allocation5 + $0xb0] sm:$0xff]  ;;  %v1391_v9 = vld [vmem:[#allocation5 + $0x68] sm:$0xff] }
  0x19   :  { %v1409_v3 = vld [vmem:[#allocation5 + $0xf8] sm:$0xff]  ;;  %667 = vmatpush.bf16.msra.mxu2 %v1401_v2  ;;  %v1408_v7 = vld [vmem:[#allocation5 + $0xf0] sm:$0xff]  ;;  %v1399_v10 = vld [vmem:[#allocation5 + $0xa8] sm:$0xff] }
  0x1a   :  { %680 = vmatpush.bf16.msra.mxu3 %v1409_v3  ;;  %v1407_v11 = vld [vmem:[#allocation5 + $0xe8] sm:$0xff]  ;;  %v1382_v12 = vld [vmem:[#allocation5 + $0x20] sm:$0xff]  ;;  %v1381_v16 = vld [vmem:[#allocation5 + $0x18] sm:$0xff] }
  0x1b   :  { %642 = vmatpush.bf16.msra.mxu0 %v1384_v4  ;;  %v1390_v13 = vld [vmem:[#allocation5 + $0x60] sm:$0xff]  ;;  %v1389_v17 = vld [vmem:[#allocation5 + $0x58] sm:$0xff]  ;;  %v1380_v20 = vld [vmem:[#allocation5 + $0x10] sm:$0xff] }
  0x1c   :  { %655 = vmatpush.bf16.msra.mxu1 %v1392_v5  ;;  %v1398_v14 = vld [vmem:[#allocation5 + $0xa0] sm:$0xff]  ;;  %v1397_v18 = vld [vmem:[#allocation5 + $0x98] sm:$0xff]  ;;  %v1388_v21 = vld [vmem:[#allocation5 + $0x50] sm:$0xff] }
  0x1d   :  { %668 = vmatpush.bf16.msra.mxu2 %v1400_v6  ;;  %v1406_v15 = vld [vmem:[#allocation5 + $0xe0] sm:$0xff]  ;;  %v1405_v19 = vld [vmem:[#allocation5 + $0xd8] sm:$0xff]  ;;  %v1396_v22 = vld [vmem:[#allocation5 + $0x90] sm:$0xff] }
  0x1e   :  { %681 = vmatpush.bf16.msra.mxu3 %v1408_v7  ;;  %v1404_v23 = vld [vmem:[#allocation5 + $0xd0] sm:$0xff]  ;;  %v1379_v24 = vld [vmem:[#allocation5 + $0x8] sm:$0xff]  ;;  %v1378_v28 = vld [vmem:[#allocation5] sm:$0xff] }
  0x1f   :  { %643 = vmatpush.bf16.msra.mxu0 %v1383_v8  ;;  %v1387_v25 = vld [vmem:[#allocation5 + $0x48] sm:$0xff]  ;;  %v1386_v29 = vld [vmem:[#allocation5 + $0x40] sm:$0xff]  ;;  %v1417_v32 = vld [vmem:[#allocation5 + $0x138] sm:$0xff] }
  0x20   :  { %656 = vmatpush.bf16.msra.mxu1 %v1391_v9  ;;  %v1395_v26 = vld [vmem:[#allocation5 + $0x88] sm:$0xff]  ;;  %v1394_v30 = vld [vmem:[#allocation5 + $0x80] sm:$0xff]  ;;  %v111_v33 = vld [vmem:[#allocation2 + $0x10] sm:$0xff] }
  0x21   :  { %669 = vmatpush.bf16.msra.mxu2 %v1399_v10  ;;  %v1403_v27 = vld [vmem:[#allocation5 + $0xc8] sm:$0xff]  ;;  %v1402_v31 = vld [vmem:[#allocation5 + $0xc0] sm:$0xff]  ;;  %v1425_v35 = vld [vmem:[#allocation5 + $0x178] sm:$0xff]  ;;  %v119_v40 = vpack.c.bf16 %v111_v33, %v111_v33 }
  0x22   :  { %682 = vmatpush.bf16.msra.mxu3 %v1407_v11  ;;  %v109_v34 = vld [vmem:[#allocation2] sm:$0xff]  ;;  %v112_v36 = vld [vmem:[#allocation2 + $0x18] sm:$0xff]  ;;  %v110_v37 = vld [vmem:[#allocation2 + $0x8] sm:$0xff] }
  0x23   :  { %644 = vmatpush.bf16.msra.mxu0 %v1382_v12  ;;  %v1433_v38 = vld [vmem:[#allocation5 + $0x1b8] sm:$0xff]  ;;  %v117_v41 = vpack.c.bf16 %v109_v34, %v109_v34  ;;  %v120_v42 = vpack.c.bf16 %v112_v36, %v112_v36  ;;  %v118_v43 = vpack.c.bf16 %v110_v37, %v110_v37  ;;  %v1416_v44 = vld [vmem:[#allocation5 + $0x130] sm:$0xff]  ;;  %v1415_v48 = vld [vmem:[#allocation5 + $0x128] sm:$0xff] }
  0x24   :  { %657 = vmatpush.bf16.msra.mxu1 %v1390_v13  ;;  %v1441_v39 = vld [vmem:[#allocation5 + $0x1f8] sm:$0xff]  ;;  %v1424_v45 = vld [vmem:[#allocation5 + $0x170] sm:$0xff]  ;;  %v1423_v49 = vld [vmem:[#allocation5 + $0x168] sm:$0xff] }
  0x25   :  { %670 = vmatpush.bf16.msra.mxu2 %v1398_v14  ;;  %v1432_v46 = vld [vmem:[#allocation5 + $0x1b0] sm:$0xff]  ;;  %v1431_v50 = vld [vmem:[#allocation5 + $0x1a8] sm:$0xff]  ;;  %v1414_v52 = vld [vmem:[#allocation5 + $0x120] sm:$0xff] }
  0x26   :  { %683 = vmatpush.bf16.msra.mxu3 %v1406_v15  ;;  %v1440_v47 = vld [vmem:[#allocation5 + $0x1f0] sm:$0xff]  ;;  %v1439_v51 = vld [vmem:[#allocation5 + $0x1e8] sm:$0xff]  ;;  %v1422_v53 = vld [vmem:[#allocation5 + $0x160] sm:$0xff] }
  0x27   :  { %645 = vmatpush.bf16.msra.mxu0 %v1381_v16  ;;  %v1430_v54 = vld [vmem:[#allocation5 + $0x1a0] sm:$0xff]  ;;  %v1413_v56 = vld [vmem:[#allocation5 + $0x118] sm:$0xff]  ;;  %v1412_v60 = vld [vmem:[#allocation5 + $0x110] sm:$0xff] }
  0x28   :  { %658 = vmatpush.bf16.msra.mxu1 %v1389_v17  ;;  %v1438_v55 = vld [vmem:[#allocation5 + $0x1e0] sm:$0xff]  ;;  %v1421_v57 = vld [vmem:[#allocation5 + $0x158] sm:$0xff]  ;;  %v1420_v61 = vld [vmem:[#allocation5 + $0x150] sm:$0xff] }
  0x29   :  { %671 = vmatpush.bf16.msra.mxu2 %v1397_v18  ;;  %v1429_v58 = vld [vmem:[#allocation5 + $0x198] sm:$0xff]  ;;  %v1428_v62 = vld [vmem:[#allocation5 + $0x190] sm:$0xff]  ;;  %v1411_v0 = vld [vmem:[#allocation5 + $0x108] sm:$0xff] }
  0x2a   :  { %684 = vmatpush.bf16.msra.mxu3 %v1405_v19  ;;  %v1437_v59 = vld [vmem:[#allocation5 + $0x1d8] sm:$0xff]  ;;  %v1436_v63 = vld [vmem:[#allocation5 + $0x1d0] sm:$0xff]  ;;  %v1419_v1 = vld [vmem:[#allocation5 + $0x148] sm:$0xff] }
  0x2b   :  { %646 = vmatpush.bf16.msra.mxu0 %v1380_v20  ;;  %v1427_v2 = vld [vmem:[#allocation5 + $0x188] sm:$0xff]  ;;  %v1410_v4 = vld [vmem:[#allocation5 + $0x100] sm:$0xff]  ;;  %v115_v10 = vld [vmem:[#allocation2 + $0x30] sm:$0xff] }
  0x2c   :  { %659 = vmatpush.bf16.msra.mxu1 %v1388_v21  ;;  %v1435_v3 = vld [vmem:[#allocation5 + $0x1c8] sm:$0xff]  ;;  %v1418_v5 = vld [vmem:[#allocation5 + $0x140] sm:$0xff]  ;;  %v116_v11 = vld [vmem:[#allocation2 + $0x38] sm:$0xff]  ;;  %v123_v14 = vpack.c.bf16 %v115_v10, %v115_v10 }
  0x2d   :  { %672 = vmatpush.bf16.msra.mxu2 %v1396_v22  ;;  %v1426_v6 = vld [vmem:[#allocation5 + $0x180] sm:$0xff]  ;;  %v114_v8 = vld [vmem:[#allocation2 + $0x28] sm:$0xff]  ;;  %v124_v15 = vpack.c.bf16 %v116_v11, %v116_v11  ;;  %v1449_v16 = vld [vmem:[#allocation7 + $0x38] sm:$0xff] }
  0x2e   :  { %685 = vmatpush.bf16.msra.mxu3 %v1404_v23  ;;  %v113_v7 = vld [vmem:[#allocation2 + $0x20] sm:$0xff]  ;;  %v122_v13 = vpack.c.bf16 %v114_v8, %v114_v8  ;;  %v1448_v19 = vld [vmem:[#allocation7 + $0x30] sm:$0xff]  ;;  %v1447_v21 = vld [vmem:[#allocation7 + $0x28] sm:$0xff] }
  0x2f   :  { %647 = vmatpush.bf16.msra.mxu0 %v1379_v24  ;;  %v1434_v9 = vld [vmem:[#allocation5 + $0x1c0] sm:$0xff]  ;;  %v121_v12 = vpack.c.bf16 %v113_v7, %v113_v7  ;;  %v1443_v33 = vld [vmem:[#allocation7 + $0x8] sm:$0xff] }
  0x30   :  { %660 = vmatpush.bf16.msra.mxu1 %v1387_v25  ;;  %v1446_v25 = vld [vmem:[#allocation7 + $0x20] sm:$0xff]  ;;  %v1463_v11 = vld [vmem:[#allocation10 + $0x28] sm:$0xff] }
  0x31   :  { %673 = vmatpush.bf16.msra.mxu2 %v1395_v26  ;;  %v1474_v26 = vld [vmem:[%s1732_s2] ss:$0 sm:$0xff] }
  0x32   :  { %686 = vmatpush.bf16.msra.mxu3 %v1403_v27 }
  0x33   :  { %648 = vmatpush.bf16.msra.mxu0 %v1378_v28  ;;  %v1445_v28 = vld [vmem:[#allocation7 + $0x18] sm:$0xff] }
  0x34   :  { %661 = vmatpush.bf16.msra.mxu1 %v1386_v29 }
  0x35   :  { %674 = vmatpush.bf16.msra.mxu2 %v1394_v30 }
  0x36   :  { %687 = vmatpush.bf16.msra.mxu3 %v1402_v31  ;;  %649 = vmatmul.bf16.vlgmr.msra.gmra.mxu0 %v117_v41  ;;  %v1444_v31 = vld [vmem:[#allocation7 + $0x10] sm:$0xff] }
  0x37   :  { %693 = vmatpush.bf16.msrb.mxu0 %v1417_v32  ;;  %662 = vmatmul.bf16.vlgmr.msra.gmra.mxu1 %v118_v43  ;;  %v1456_v41 = vld [vmem:[#allocation8 + $0x30] sm:$0xff] }
  0x38   :  { %706 = vmatpush.bf16.msrb.mxu1 %v1425_v35  ;;  %675 = vmatmul.bf16.vlgmr.msra.gmra.mxu2 %v119_v40  ;;  %v1442_v35 = vld [vmem:[#allocation7] sm:$0xff]  ;;  %v1457_v40 = vld [vmem:[#allocation8 + $0x38] sm:$0xff] }
  0x39   :  { %719 = vmatpush.bf16.msrb.mxu2 %v1433_v38  ;;  %688 = vmatmul.bf16.vlgmr.msra.gmra.mxu3 %v120_v42 }
  0x3a   :  { %732 = vmatpush.bf16.msrb.mxu3 %v1441_v39 }
  0x3b   :  { %694 = vmatpush.bf16.msrb.mxu0 %v1416_v44 }
  0x3c   :  { %707 = vmatpush.bf16.msrb.mxu1 %v1424_v45 }
  0x3d   :  { %720 = vmatpush.bf16.msrb.mxu2 %v1432_v46 }
  0x3e   :  { %733 = vmatpush.bf16.msrb.mxu3 %v1440_v47 }
  0x3f   :  { %695 = vmatpush.bf16.msrb.mxu0 %v1415_v48 }
  0x40   :  { %708 = vmatpush.bf16.msrb.mxu1 %v1423_v49 }
  0x41   :  { %721 = vmatpush.bf16.msrb.mxu2 %v1431_v50 }
  0x42   :  { %734 = vmatpush.bf16.msrb.mxu3 %v1439_v51 }
  0x43   :  { %696 = vmatpush.bf16.msrb.mxu0 %v1414_v52 }
  0x44   :  { %709 = vmatpush.bf16.msrb.mxu1 %v1422_v53 }
  0x45   :  { %722 = vmatpush.bf16.msrb.mxu2 %v1430_v54 }
  0x46   :  { %735 = vmatpush.bf16.msrb.mxu3 %v1438_v55 }
  0x47   :  { %697 = vmatpush.bf16.msrb.mxu0 %v1413_v56 }
  0x48   :  { %710 = vmatpush.bf16.msrb.mxu1 %v1421_v57  ;;  %v1455_v57 = vld [vmem:[#allocation8 + $0x28] sm:$0xff] }
  0x49   :  { %723 = vmatpush.bf16.msrb.mxu2 %v1429_v58  ;;  %v1454_v58 = vld [vmem:[#allocation8 + $0x20] sm:$0xff] }
  0x4a   :  { %736 = vmatpush.bf16.msrb.mxu3 %v1437_v59  ;;  %v1453_v59 = vld [vmem:[#allocation8 + $0x18] sm:$0xff] }
  0x4b   :  { %698 = vmatpush.bf16.msrb.mxu0 %v1412_v60  ;;  %v1452_v60 = vld [vmem:[#allocation8 + $0x10] sm:$0xff] }
  0x4c   :  { %711 = vmatpush.bf16.msrb.mxu1 %v1420_v61  ;;  %v1451_v61 = vld [vmem:[#allocation8 + $0x8] sm:$0xff] }
  0x4d   :  { %724 = vmatpush.bf16.msrb.mxu2 %v1428_v62  ;;  %v1450_v62 = vld [vmem:[#allocation8] sm:$0xff] }
  0x4e   :  { %737 = vmatpush.bf16.msrb.mxu3 %v1436_v63  ;;  %v1465_v63 = vld [vmem:[#allocation10 + $0x38] sm:$0xff] }
  0x4f   :  { %699 = vmatpush.bf16.msrb.mxu0 %v1411_v0  ;;  %v1464_v0 = vld [vmem:[#allocation10 + $0x30] sm:$0xff] }
  0x50   :  { %712 = vmatpush.bf16.msrb.mxu1 %v1419_v1  ;;  %v1475_v1 = vld [vmem:[%s1734_s4] ss:$0 sm:$0xff] }
  0x51   :  { %725 = vmatpush.bf16.msrb.mxu2 %v1427_v2 }
  0x52   :  { %738 = vmatpush.bf16.msrb.mxu3 %v1435_v3 }
  0x53   :  { %700 = vmatpush.bf16.msrb.mxu0 %v1410_v4 }
  0x54   :  { %713 = vmatpush.bf16.msrb.mxu1 %v1418_v5 }
  0x55   :  { %726 = vmatpush.bf16.msrb.mxu2 %v1426_v6 }
  0x56   :  { %739 = vmatpush.bf16.msrb.mxu3 %v1434_v9  ;;  %701 = vmatmul.bf16.vlgmr.msrb.gmra.mxu0 %v121_v12  ;;  %v1462_v12 = vld [vmem:[#allocation10 + $0x20] sm:$0xff] }
  0x57   :  { %714 = vmatmul.bf16.vlgmr.msrb.gmra.mxu1 %v122_v13  ;;  %819 = vmatpush.bf16.msra.mxu0 %v1449_v16  ;;  %v1461_v13 = vld [vmem:[#allocation10 + $0x18] sm:$0xff]  ;;  %v1458_v16 = vld [vmem:[#allocation10] sm:$0xff] }
  0x58   :  { %727 = vmatmul.bf16.vlgmr.msrb.gmra.mxu2 %v123_v14  ;;  %906 = vmatpush.bf16.msra.mxu1 %v1457_v40  ;;  %v1460_v14 = vld [vmem:[#allocation10 + $0x10] sm:$0xff] }
  0x59   :  { %740 = vmatmul.bf16.vlgmr.msrb.gmra.mxu3 %v124_v15  ;;  %993 = vmatpush.bf16.msra.mxu2 %v1465_v63  ;;  %v1459_v15 = vld [vmem:[#allocation10 + $0x8] sm:$0xff] }
  0x5b   :  { %820 = vmatpush.bf16.msra.mxu0 %v1448_v19 }
  0x5c   :  { %907 = vmatpush.bf16.msra.mxu1 %v1456_v41 }
  0x5d   :  { %994 = vmatpush.bf16.msra.mxu2 %v1464_v0 }
  0x5f   :  { %821 = vmatpush.bf16.msra.mxu0 %v1447_v21 }
  0x60   :  { %908 = vmatpush.bf16.msra.mxu1 %v1455_v57 }
  0x61   :  { %995 = vmatpush.bf16.msra.mxu2 %v1463_v11 }
  0x63   :  { %822 = vmatpush.bf16.msra.mxu0 %v1446_v25 }
  0x64   :  { %909 = vmatpush.bf16.msra.mxu1 %v1454_v58 }
  0x65   :  { %996 = vmatpush.bf16.msra.mxu2 %v1462_v12 }
  0x67   :  { %823 = vmatpush.bf16.msra.mxu0 %v1445_v28 }
  0x68   :  { %910 = vmatpush.bf16.msra.mxu1 %v1453_v59 }
  0x69   :  { %997 = vmatpush.bf16.msra.mxu2 %v1461_v13 }
  0x6b   :  { %824 = vmatpush.bf16.msra.mxu0 %v1444_v31 }
  0x6c   :  { %911 = vmatpush.bf16.msra.mxu1 %v1452_v60 }
  0x6d   :  { %998 = vmatpush.bf16.msra.mxu2 %v1460_v14 }
  0x6f   :  { %825 = vmatpush.bf16.msra.mxu0 %v1443_v33 }
  0x70   :  { %912 = vmatpush.bf16.msra.mxu1 %v1451_v61 }
  0x71   :  { %999 = vmatpush.bf16.msra.mxu2 %v1459_v15 }
  0x73   :  { %826 = vmatpush.bf16.msra.mxu0 %v1442_v35 }
  0x74   :  { %913 = vmatpush.bf16.msra.mxu1 %v1450_v62 }
  0x75   :  { %1000 = vmatpush.bf16.msra.mxu2 %v1458_v16 }
  0xb3   :  { %v650_v17 = vpop.f32.mrf.mxu0 }
  0xb4   :  { %v663_v18 = vpop.f32.mrf.mxu1  ;;  %v651_v30 = vadd.f32 %v1474_v26, %v650_v17  ;;  %v1476_v17 = vld [vmem:[%s1736_s6] ss:$0 sm:$0xff] }
  0xb6   :  { %v664_v32 = vadd.f32 %v663_v18, %v651_v30 }
  0xbb   :  { %v676_v20 = vpop.f32.mrf.mxu2  ;;  %v652_v23 = vpop.f32.mrf.mxu0 }
  0xbc   :  { %v689_v22 = vpop.f32.mrf.mxu3  ;;  %v665_v24 = vpop.f32.mrf.mxu1  ;;  %v677_v34 = vadd.f32 %v676_v20, %v664_v32 }
  0xbe   :  { %v690_v36 = vadd.f32 %v689_v22, %v677_v34 }
  0xc3   :  { %v678_v27 = vpop.f32.mrf.mxu2 }
  0xc4   :  { %v691_v29 = vpop.f32.mrf.mxu3  ;;  %v1477_v27 = vld [vmem:[%s1738_s8] ss:$0 sm:$0xff] }
  0xd3   :  { %v702_v37 = vpop.f32.mrf.mxu0 }
  0xd4   :  { %v715_v38 = vpop.f32.mrf.mxu1  ;;  %v703_v39 = vadd.f32 %v702_v37, %v690_v36 }
  0xd6   :  { %v716_v42 = vadd.f32 %v715_v38, %v703_v39 }
  0xdb   :  { %v728_v43 = vpop.f32.mrf.mxu2  ;;  %v704_v46 = vpop.f32.mrf.mxu0 }
  0xdc   :  { %v741_v44 = vpop.f32.mrf.mxu3  ;;  %v729_v45 = vadd.f32 %v728_v43, %v716_v42  ;;  %v717_v47 = vpop.f32.mrf.mxu1 }
  0xde   :  { %v742_v48 = vadd.f32 %v741_v44, %v729_v45 }
  0xe0   :  { %v745_v49 = vsub.f32 0.0, %v742_v48 }
  0xe2   :  { %v746_v50 = vmul.f32 1.442695, %v745_v49 }
  0xe3   :  { %v730_v51 = vpop.f32.mrf.mxu2 }
  0xe4   :  { %v743_v52 = vpop.f32.mrf.mxu3  ;;  %1478 = vpow2.f32 %v746_v50 }
  0xea   :  { %v1479_v53 = vpop.eup %1478 }
  0xeb   :  { %v748_v54 = vadd.f32 1.0, %v1479_v53 }
  0xed   :  { %1480 = vrcp.f32 %v748_v54 }
  0xf3   :  { %v1481_v55 = vpop.eup %1480 }
  0xf4   :  { %v750_v56 = vpack.c.bf16 %v1481_v55, %v1481_v55 }
  0xf6   :  { %827 = vmatmul.bf16.vlgmr.msra.gmra.mxu0 %v750_v56 }
 0x173   :  { %v828_v2 = vpop.f32.mrf.mxu0 }
 0x174   :  { %v829_v3 = vadd.f32 %v1475_v1, %v828_v2 }
 0x176   :  { %v832_v4 = vsub.f32 0.0, %v829_v3 }
 0x178   :  { %v833_v5 = vmul.f32 1.442695, %v832_v4 }
 0x17a   :  { %1482 = vpow2.f32 %v833_v5 }
 0x17b   :  { %v830_v6 = vpop.f32.mrf.mxu0 }
 0x180   :  { %v1483_v7 = vpop.eup %1482 }
 0x181   :  { %v835_v8 = vadd.f32 1.0, %v1483_v7 }
 0x183   :  { %1484 = vrcp.f32 %v835_v8 }
 0x189   :  { %v1485_v9 = vpop.eup %1484 }
 0x18a   :  { %v837_v10 = vpack.c.bf16 %v1485_v9, %v1485_v9 }
 0x18c   :  { %914 = vmatmul.bf16.vlgmr.msra.gmra.mxu1 %v837_v10 }
 0x209   :  { %v915_v18 = vpop.f32.mrf.mxu1 }
 0x20a   :  { %v916_v19 = vadd.f32 %v1476_v17, %v915_v18 }
 0x20c   :  { %v919_v20 = vsub.f32 0.0, %v916_v19 }
 0x20e   :  { %v920_v21 = vmul.f32 1.442695, %v919_v20 }
 0x210   :  { %1486 = vpow2.f32 %v920_v21 }
 0x211   :  { %v917_v22 = vpop.f32.mrf.mxu1 }
 0x216   :  { %v1487_v23 = vpop.eup %1486 }
 0x217   :  { %v922_v24 = vadd.f32 1.0, %v1487_v23 }
 0x219   :  { %1488 = vrcp.f32 %v922_v24 }
 0x21f   :  { %v1489_v25 = vpop.eup %1488 }
 0x220   :  { %v924_v26 = vpack.c.bf16 %v1489_v25, %v1489_v25 }
 0x222   :  { %1001 = vmatmul.bf16.vlgmr.msra.gmra.mxu2 %v924_v26 }
 0x2a5   :  { %v1002_v28 = vpop.f32.mrf.mxu2 }
 0x2a6   :  { %v1003_v29 = vadd.f32 %v1477_v27, %v1002_v28 }
 0x2a8   :  { %1006 = vst [vmem:[#allocation11] sm:$0xff] %v1003_v29 }
 0x2a9   :  { %1017 = dma.vmem_to_hbm [thread:$0]  %s1013_s17, 128, %s1015_s19, [#allocation4]  }
 0x2ad   :  { %v1004_v30 = vpop.f32.mrf.mxu2 }
 0x2ae   :  { %1640 = dma.done.wait [#allocation4], 128  }
 0x2af   :  { %1641 = vsyncadd [#allocation4], 4294967168 }
 0x2b0   :  { %1022 = vsyncpa [#allocation3], 1 }
 0x2b1   :  { %1023 = vsyncpa [#allocation6], 1 }
 0x2b2   :  { %1024 = vsyncpa [#allocation9], 1 }
 0x2b3   :  { %1025 = vsyncpa [#allocation4], 1 }

</bundles_post_ra>
